<compile_context>
chip_gen: v7x
topology: tpu7x:2x2x1
jax: 0.10.0
libtpu: 0.0.40
codegen_flags: <defaults>
</compile_context>

<pallas_src>
import functools

import jax
import jax.numpy as jnp
from jax.experimental import pallas as pl
from jax.experimental.pallas import tpu as pltpu

_F_NORMALIZE_EPS = 1e-12          # torch.nn.functional.normalize default eps
_F_NORMALIZE_EPS_SQ = _F_NORMALIZE_EPS * _F_NORMALIZE_EPS


def _round_up(x, m):
    return ((x + m - 1) // m) * m


def _normed_pairwise_dist_kernel(x_ref, et_ref, out_ref, acc_ref, xsq_ref, esq_ref):
    """Grid (i, j, k).  x_ref: (tm, tk), et_ref: (tk, tn), out_ref: (tm, tn)."""
    k = pl.program_id(2)

    @pl.when(k == 0)
    def _init():
        acc_ref[...] = jnp.zeros_like(acc_ref)
        xsq_ref[...] = jnp.zeros_like(xsq_ref)
        esq_ref[...] = jnp.zeros_like(esq_ref)

    x = x_ref[...]                                  # (tm, tk) f32
    et = et_ref[...]                                # (tk, tn) f32

    # MXU: raw (un-normalized) Gram tile accumulation over the D (k) axis.
    acc_ref[...] += jnp.dot(x, et, preferred_element_type=jnp.float32)
    # Row / column sum-of-squares, accumulated over k.
    xsq_ref[...] += jnp.sum(x * x, axis=1, keepdims=True)    # (tm, 1)
    esq_ref[...] += jnp.sum(et * et, axis=0, keepdims=True)  # (1, tn)

    @pl.when(k == pl.num_programs(2) - 1)
    def _finalize():
        # 1 / max(||v||, eps)  ==  rsqrt(max(||v||^2, eps^2))   (EUP rsqrt)
        inv_xn = jax.lax.rsqrt(jnp.maximum(xsq_ref[...], _F_NORMALIZE_EPS_SQ))
        inv_en = jax.lax.rsqrt(jnp.maximum(esq_ref[...], _F_NORMALIZE_EPS_SQ))
        cos = acc_ref[...] * inv_xn * inv_en                   # (tm, tn)
        # ||a - b||^2 = 2 - 2*cos for unit vectors; clamp to [0, 4] so the
        # downstream arcsin(d/2) never sees an argument > 1.
        sq = jnp.clip(2.0 - 2.0 * cos, 0.0, 4.0)
        out_ref[...] = jnp.sqrt(sq)


@functools.partial(jax.jit, static_argnames=("tm", "tn", "tk"))
def normed_pairwise_dist(x, e_t, *, tm=256, tn=256, tk=512):
    """dists[n, m] = || normalize(x[n]) - normalize(e_t[:, m]) ||_2.

    x:   (N, D) float32
    e_t: (D, M) float32   (embed pre-transposed so the MXU contraction is
                           ((1,),(0,)) and the output stays lane-dense)
    Returns (N_pad, M_pad) float32; caller slices [:N, :M].
    """
    n, d = x.shape
    d2, m = e_t.shape
    assert d == d2, "feature dims must match"

    # Clamp tiles to the (padded) problem size; keep (8, 128) layout legality.
    tm = min(tm, _round_up(n, 8))
    tn = min(tn, _round_up(m, 128))
    tk = min(tk, _round_up(d, 128))

    n_pad = _round_up(n, tm)
    m_pad = _round_up(m, tn)
    d_pad = _round_up(d, tk)

    x_p = jnp.pad(x, ((0, n_pad - n), (0, d_pad - d)))
    e_p = jnp.pad(e_t, ((0, d_pad - d), (0, m_pad - m)))

    grid = (n_pad // tm, m_pad // tn, d_pad // tk)

    return pl.pallas_call(
        _normed_pairwise_dist_kernel,
        out_shape=jax.ShapeDtypeStruct((n_pad, m_pad), jnp.float32),
        grid=grid,
        in_specs=[
            pl.BlockSpec((tm, tk), lambda i, j, k: (i, k)),
            pl.BlockSpec((tk, tn), lambda i, j, k: (k, j)),
        ],
        out_specs=pl.BlockSpec((tm, tn), lambda i, j, k: (i, j)),
        scratch_shapes=[
            pltpu.VMEM((tm, tn), jnp.float32),   # Gram accumulator
            pltpu.VMEM((tm, 1), jnp.float32),    # sum(x^2) per row
            pltpu.VMEM((1, tn), jnp.float32),    # sum(e^2) per column
        ],
        compiler_params=pltpu.CompilerParams(
            dimension_semantics=("parallel", "parallel", "arbitrary"),
            vmem_limit_bytes=32 * 1024 * 1024,
        ),
    )(x_p, e_p)


def prompt_forward(input_x, embed, weight=1.0, stop=float("-inf"),
                   *, tm=256, tn=256, tk=512):
    """JAX/Pallas equivalent of Prompt.forward (forward pass only)."""
    del stop  # `stop` only affects the custom backward (replace_grad); forward ignores it.
    w = jnp.asarray(weight, dtype=jnp.float32)

    x = jnp.asarray(input_x, dtype=jnp.float32)
    e = jnp.asarray(embed, dtype=jnp.float32)
    n, _ = x.shape
    m, _ = e.shape

    # One-time transpose in the wrapper keeps the contraction dim leading for
    # the MXU and avoids an in-kernel XLU transpose of e every call.
    dists = normed_pairwise_dist(x, e.T, tm=tm, tn=tn, tk=tk)[:n, :m]

    # TODO(synk): fuse the arcsin epilogue + mean partial-reduction into the
    # kernel once asin lowering lands in Mosaic; done here on the tiny (N, M)
    # output (padded rows/cols already sliced away so the mean is exact).
    dists = jnp.square(jnp.arcsin(dists * 0.5)) * 2.0
    dists = dists * jnp.sign(w)
    # replace_grad(dists, maximum(dists, stop)) is identity in the forward pass.
    return jnp.abs(w) * jnp.mean(dists)


def _prompt_forward_ref(input_x, embed, weight=1.0):
    """Pure-JAX reference mirroring the PyTorch ops literally."""
    w = jnp.asarray(weight, dtype=jnp.float32)
    xn = input_x / jnp.maximum(
        jnp.linalg.norm(input_x, axis=-1, keepdims=True), _F_NORMALIZE_EPS)
    en = embed / jnp.maximum(
        jnp.linalg.norm(embed, axis=-1, keepdims=True), _F_NORMALIZE_EPS)
    diff = xn[:, None, :] - en[None, :, :]                      # (N, M, D)
    dists = jnp.linalg.norm(diff, axis=2)
    dists = jnp.square(jnp.arcsin(dists / 2.0)) * 2.0
    dists = dists * jnp.sign(w)
    return jnp.abs(w) * jnp.mean(dists)


if __name__ == "__main__":
    key = jax.random.PRNGKey(0)

    # --- Test 1: module-sized toy shapes (single grid point after padding) ---
    k_x, k_e, key = (*jax.random.split(key, 2), key)
    N, M, D = 8, 4, 32
    x = jax.random.normal(k_x, (N, D), dtype=jnp.float32)
    embed = jax.random.normal(k_e, (M, D), dtype=jnp.float32)
    weight = 1.5

    out = jax.block_until_ready(prompt_forward(x, embed, weight=weight,
                                               stop=float("-inf")))
    ref = jax.block_until_ready(_prompt_forward_ref(x, embed, weight=weight))
    assert jnp.allclose(out, ref, rtol=1e-5, atol=1e-5), (out, ref)

    # --- Test 2: exercise multi-tile i / j / k (padding + k-accumulation) ---
    k_x2, k_e2 = jax.random.split(jax.random.PRNGKey(1))
    N2, M2, D2 = 48, 136, 384
    x2 = jax.random.normal(k_x2, (N2, D2), dtype=jnp.float32)
    embed2 = jax.random.normal(k_e2, (M2, D2), dtype=jnp.float32)
    weight2 = -0.75   # exercises sign(weight) / abs(weight) path too

    out2 = jax.block_until_ready(prompt_forward(x2, embed2, weight=weight2,
                                                stop=float("-inf"),
                                                tm=16, tn=128, tk=128))
    ref2 = jax.block_until_ready(_prompt_forward_ref(x2, embed2, weight=weight2))
    assert jnp.allclose(out2, ref2, rtol=1e-4, atol=1e-5), (out2, ref2)

    print("KERNEL_OK")
</pallas_src>

<mosaic_0001>
module attributes {stable_mosaic.version = 11 : i64} {
  func.func @_normed_pairwise_dist_kernel(%arg0: i32, %arg1: i32, %arg2: i32, %arg3: memref<8x128xf32, #tpu.memory_space<vmem>>, %arg4: memref<128x128xf32, #tpu.memory_space<vmem>>, %arg5: memref<8x128xf32, #tpu.memory_space<vmem>>, %arg6: memref<8x128xf32, #tpu.memory_space<vmem>>, %arg7: memref<8x1xf32, #tpu.memory_space<vmem>>, %arg8: memref<1x128xf32, #tpu.memory_space<vmem>>) attributes {dimension_semantics = [#tpu.dimension_semantics<parallel>, #tpu.dimension_semantics<parallel>, #tpu.dimension_semantics<arbitrary>], iteration_bounds = array<i64: 1, 1, 1>, scalar_prefetch = 0 : i64, scratch_operands = 3 : i64, tpu.core_type = #tpu.core_type<tc>, window_params = [{transform_indices = @transform_0, window_bounds = array<i64: 8, 128>}, {transform_indices = @transform_1, window_bounds = array<i64: 128, 128>}, {transform_indices = @transform_2, window_bounds = array<i64: 8, 128>}]} {
    %c0_i32 = arith.constant 0 : i32
    %0 = arith.cmpi eq, %arg2, %c0_i32 : i32
    %1 = arith.extui %0 : i1 to i32
    %c0_i32_0 = arith.constant 0 : i32
    %2 = arith.cmpi ne, %1, %c0_i32_0 : i32
    scf.if %2 {
      %cst_20 = arith.constant 0.000000e+00 : f32
      %24 = vector.broadcast %cst_20 : f32 to vector<8x128xf32>
      %c0_21 = arith.constant 0 : index
      %c0_22 = arith.constant 0 : index
      %25 = vector.load %arg6[%c0_21, %c0_22] : memref<8x128xf32, #tpu.memory_space<vmem>>, vector<8x128xf32>
      tpu.vector_store %arg6[%c0_21, %c0_22], %24 {strides = array<i32>} : memref<8x128xf32, #tpu.memory_space<vmem>>, vector<8x128xf32>,
      %cst_23 = arith.constant 0.000000e+00 : f32
      %26 = vector.broadcast %cst_23 : f32 to vector<8x1xf32>
      %c0_24 = arith.constant 0 : index
      %c0_25 = arith.constant 0 : index
      %27 = vector.load %arg7[%c0_24, %c0_25] : memref<8x1xf32, #tpu.memory_space<vmem>>, vector<8x1xf32>
      tpu.vector_store %arg7[%c0_24, %c0_25], %26 {strides = array<i32>} : memref<8x1xf32, #tpu.memory_space<vmem>>, vector<8x1xf32>,
      %cst_26 = arith.constant 0.000000e+00 : f32
      %28 = vector.broadcast %cst_26 : f32 to vector<1x128xf32>
      %c0_27 = arith.constant 0 : index
      %c0_28 = arith.constant 0 : index
      %29 = vector.load %arg8[%c0_27, %c0_28] : memref<1x128xf32, #tpu.memory_space<vmem>>, vector<1x128xf32>
      tpu.vector_store %arg8[%c0_27, %c0_28], %28 {strides = array<i32>} : memref<1x128xf32, #tpu.memory_space<vmem>>, vector<1x128xf32>,
    } else {
    }
    %c0 = arith.constant 0 : index
    %c0_1 = arith.constant 0 : index
    %3 = vector.load %arg3[%c0, %c0_1] : memref<8x128xf32, #tpu.memory_space<vmem>>, vector<8x128xf32>
    %c0_2 = arith.constant 0 : index
    %c0_3 = arith.constant 0 : index
    %4 = vector.load %arg4[%c0_2, %c0_3] : memref<128x128xf32, #tpu.memory_space<vmem>>, vector<128x128xf32>
    %c0_4 = arith.constant 0 : index
    %c0_5 = arith.constant 0 : index
    %5 = vector.load %arg6[%c0_4, %c0_5] : memref<8x128xf32, #tpu.memory_space<vmem>>, vector<8x128xf32>
    %cst = arith.constant dense<0.000000e+00> : vector<8x128xf32>
    %6 = tpu.matmul %3, %4, %cst {dimension_numbers = #tpu.dot_dimension_numbers<[1], [0], [0], [1], [0, 0, 1, 1], [], []>} : vector<8x128xf32>, vector<128x128xf32>, vector<8x128xf32> -> vector<8x128xf32>
    %7 = arith.addf %5, %6 : vector<8x128xf32>
    %c0_6 = arith.constant 0 : index
    %c0_7 = arith.constant 0 : index
    %8 = vector.load %arg6[%c0_6, %c0_7] : memref<8x128xf32, #tpu.memory_space<vmem>>, vector<8x128xf32>
    tpu.vector_store %arg6[%c0_6, %c0_7], %7 {strides = array<i32>} : memref<8x128xf32, #tpu.memory_space<vmem>>, vector<8x128xf32>,
    %c0_8 = arith.constant 0 : index
    %c0_9 = arith.constant 0 : index
    %9 = vector.load %arg7[%c0_8, %c0_9] : memref<8x1xf32, #tpu.memory_space<vmem>>, vector<8x1xf32>
    %10 = arith.mulf %3, %3 : vector<8x128xf32>
    %cst_10 = arith.constant dense<0.000000e+00> : vector<8xf32>
    %11 = vector.multi_reduction <add>, %10, %cst_10 [1] : vector<8x128xf32> to vector<8xf32>
    %12 = vector.shape_cast %11 : vector<8xf32> to vector<8x1xf32>
    %13 = arith.addf %9, %12 : vector<8x1xf32>
    %c0_11 = arith.constant 0 : index
    %c0_12 = arith.constant 0 : index
    %14 = vector.load %arg7[%c0_11, %c0_12] : memref<8x1xf32, #tpu.memory_space<vmem>>, vector<8x1xf32>
    tpu.vector_store %arg7[%c0_11, %c0_12], %13 {strides = array<i32>} : memref<8x1xf32, #tpu.memory_space<vmem>>, vector<8x1xf32>,
    %c0_13 = arith.constant 0 : index
    %c0_14 = arith.constant 0 : index
    %15 = vector.load %arg8[%c0_13, %c0_14] : memref<1x128xf32, #tpu.memory_space<vmem>>, vector<1x128xf32>
    %16 = arith.mulf %4, %4 : vector<128x128xf32>
    %cst_15 = arith.constant dense<0.000000e+00> : vector<128xf32>
    %17 = vector.multi_reduction <add>, %16, %cst_15 [0] : vector<128x128xf32> to vector<128xf32>
    %18 = vector.shape_cast %17 : vector<128xf32> to vector<1x128xf32>
    %19 = arith.addf %15, %18 : vector<1x128xf32>
    %c0_16 = arith.constant 0 : index
    %c0_17 = arith.constant 0 : index
    %20 = vector.load %arg8[%c0_16, %c0_17] : memref<1x128xf32, #tpu.memory_space<vmem>>, vector<1x128xf32>
    tpu.vector_store %arg8[%c0_16, %c0_17], %19 {strides = array<i32>} : memref<1x128xf32, #tpu.memory_space<vmem>>, vector<1x128xf32>,
    %c0_i32_18 = arith.constant 0 : i32
    %21 = arith.cmpi eq, %arg2, %c0_i32_18 : i32
    %22 = arith.extui %21 : i1 to i32
    %c0_i32_19 = arith.constant 0 : i32
    %23 = arith.cmpi ne, %22, %c0_i32_19 : i32
    scf.if %23 {
      %c0_20 = arith.constant 0 : index
      %c0_21 = arith.constant 0 : index
      %24 = vector.load %arg7[%c0_20, %c0_21] : memref<8x1xf32, #tpu.memory_space<vmem>>, vector<8x1xf32>
      %cst_22 = arith.constant 1.000000e-24 : f32
      %25 = vector.broadcast %cst_22 : f32 to vector<8x1xf32>
      %26 = arith.maximumf %24, %25 : vector<8x1xf32>
      %27 = math.rsqrt %26 : vector<8x1xf32>
      %c0_23 = arith.constant 0 : index
      %c0_24 = arith.constant 0 : index
      %28 = vector.load %arg8[%c0_23, %c0_24] : memref<1x128xf32, #tpu.memory_space<vmem>>, vector<1x128xf32>
      %cst_25 = arith.constant 1.000000e-24 : f32
      %29 = vector.broadcast %cst_25 : f32 to vector<1x128xf32>
      %30 = arith.maximumf %28, %29 : vector<1x128xf32>
      %31 = math.rsqrt %30 : vector<1x128xf32>
      %c0_26 = arith.constant 0 : index
      %c0_27 = arith.constant 0 : index
      %32 = vector.load %arg6[%c0_26, %c0_27] : memref<8x128xf32, #tpu.memory_space<vmem>>, vector<8x128xf32>
      %33 = vector.broadcast %27 : vector<8x1xf32> to vector<8x128xf32>
      %34 = arith.mulf %32, %33 : vector<8x128xf32>
      %35 = vector.broadcast %31 : vector<1x128xf32> to vector<8x128xf32>
      %36 = arith.mulf %34, %35 : vector<8x128xf32>
      %cst_28 = arith.constant 2.000000e+00 : f32
      %37 = vector.broadcast %cst_28 : f32 to vector<8x128xf32>
      %38 = arith.mulf %37, %36 : vector<8x128xf32>
      %cst_29 = arith.constant 2.000000e+00 : f32
      %39 = vector.broadcast %cst_29 : f32 to vector<8x128xf32>
      %40 = arith.subf %39, %38 : vector<8x128xf32>
      %cst_30 = arith.constant 0.000000e+00 : f32
      %cst_31 = arith.constant 4.000000e+00 : f32
      %41 = vector.broadcast %cst_30 : f32 to vector<8x128xf32>
      %42 = arith.maximumf %41, %40 : vector<8x128xf32>
      %43 = vector.broadcast %cst_31 : f32 to vector<8x128xf32>
      %44 = arith.minimumf %43, %42 : vector<8x128xf32>
      %45 = math.sqrt %44 : vector<8x128xf32>
      %c0_32 = arith.constant 0 : index
      %c0_33 = arith.constant 0 : index
      %46 = vector.load %arg5[%c0_32, %c0_33] : memref<8x128xf32, #tpu.memory_space<vmem>>, vector<8x128xf32>
      tpu.vector_store %arg5[%c0_32, %c0_33], %45 {strides = array<i32>} : memref<8x128xf32, #tpu.memory_space<vmem>>, vector<8x128xf32>,
    } else {
    }
    return
  }
  func.func @transform_0(%arg0: i32, %arg1: i32, %arg2: i32) -> (i32, i32) {
    %c0_i32 = arith.constant 0 : i32
    return %arg0, %arg2 : i32, i32
  }
  func.func @transform_1(%arg0: i32, %arg1: i32, %arg2: i32) -> (i32, i32) {
    %c0_i32 = arith.constant 0 : i32
    return %arg2, %arg1 : i32, i32
  }
  func.func @transform_2(%arg0: i32, %arg1: i32, %arg2: i32) -> (i32, i32) {
    %c0_i32 = arith.constant 0 : i32
    return %arg0, %arg1 : i32, i32
  }
}

</mosaic_0001>

<bundles_post_ra>
// kernel: normed_pairwise_dist.1
= control target key start
LH: loop header
LB: loop body
LE: loop exit
PB: predicated region body
PF: predicated region fallthrough
CT: control target
= control target key end

     0   :  { %vm17_vm0 = vcmask 7168   ;;  %v318_v4 = vmov 0.0|0.0   ;;  %v319_v10 = vmov 0.0   ;;  %vm320_vm1 = vmmov 0   ;;  %s416_s0 = inlined_call_operand.vmem [shape: f32[8,128], index: 0, kind: input, shape index: {}]   ;;  %s417_s1 = inlined_call_operand.vmem [shape: f32[128,128], index: 1, kind: input, shape index: {}]   ;;  %s418_s2 = inlined_call_operand.hbm [shape: f32[8,128], index: 2, kind: output, shape index: {}]  }
   0x1   :  { %v341_v0 = vld [vmem:[%s416_s0] sm:$0xff]  ;;  %v22_v2 = vld [vmem:[%s417_s1 + $0x8] sm:$0xff]  ;;  %258 = vmatprep.subr.bf16.mxu0 %v318_v4  ;;  %v23_v8 = vld [vmem:[%s417_s1 + $0x10] sm:$0xff]  ;;  %18 = vst.msk [vmem:[#allocation3] sm:$0xff] %vm17_vm0, %v319_v10  ;;  %255 = vmatprep.mubr.msk.f32.mxu0 %vm320_vm1, %v319_v10 }
   0x2   :  { %v21_v1 = vld [vmem:[%s417_s1] sm:$0xff]  ;;  %v111_v3 = vmul.f32 %v341_v0, %v341_v0  ;;  %v119_v7 = vmul.f32 %v22_v2, %v22_v2  ;;  %v24_v9 = vld [vmem:[%s417_s1 + $0x18] sm:$0xff]  ;;  %19 = vst [vmem:[#allocation4] sm:$0x1] %v319_v10  ;;  %v120_v11 = vmul.f32 %v23_v8, %v23_v8  ;;  %v26_v16 = vld [vmem:[%s417_s1 + $0x28] sm:$0xff] }
   0x3   :  { %v259_v5 = vpack.c.bf16 %v22_v2, %v21_v1  ;;  %v118_v6 = vmul.f32 %v21_v1, %v21_v1  ;;  %v262_v13 = vpack.c.bf16 %v24_v9, %v23_v8  ;;  %v121_v14 = vmul.f32 %v24_v9, %v24_v9  ;;  %v25_v15 = vld [vmem:[%s417_s1 + $0x20] sm:$0xff] }
   0x4   :  { %112 = vadd.xlane.f32.xlu0 %v111_v3  ;;  %v122_v18 = vmul.f32 %v25_v15, %v25_v15 }
   0x5   :  { %260 = vmatpush3.bf16.msra.mxu0 %v259_v5  ;;  %v134_v12 = vadd.f32 %v119_v7, %v118_v6 }
   0x6   :  { %261 = vmatprep.subr.bf16.mxu0 %v318_v4 }
   0x7   :  { %v135_v17 = vadd.f32 %v134_v12, %v120_v11 }
   0x8   :  { %7 = vsyncpa [#allocation6], 0  ;;  %v265_v20 = vpack.c.bf16 %v26_v16, %v25_v15  ;;  %v123_v21 = vmul.f32 %v26_v16, %v26_v16  ;;  %v27_v22 = vld [vmem:[%s417_s1 + $0x30] sm:$0xff]  ;;  %v28_v23 = vld [vmem:[%s417_s1 + $0x38] sm:$0xff]  ;;  %v321_v45 = vmov 0  }
   0x9   :  { %263 = vmatpush3.bf16.msra.mxu0 %v262_v13  ;;  %v136_v19 = vadd.f32 %v135_v17, %v121_v14  ;;  %v124_v25 = vmul.f32 %v27_v22, %v27_v22  ;;  %v268_v27 = vpack.c.bf16 %v28_v23, %v27_v22  ;;  %v125_v28 = vmul.f32 %v28_v23, %v28_v23  ;;  %v29_v29 = vld [vmem:[%s417_s1 + $0x40] sm:$0xff]  ;;  %v30_v30 = vld [vmem:[%s417_s1 + $0x48] sm:$0xff]  ;;  %v31_v36 = vld [vmem:[%s417_s1 + $0x50] sm:$0xff] }
   0xa   :  { %264 = vmatprep.subr.bf16.mxu0 %v318_v4  ;;  %v126_v32 = vmul.f32 %v29_v29, %v29_v29  ;;  %v271_v34 = vpack.c.bf16 %v30_v30, %v29_v29  ;;  %v127_v35 = vmul.f32 %v30_v30, %v30_v30  ;;  %v32_v37 = vld [vmem:[%s417_s1 + $0x58] sm:$0xff]  ;;  %v128_v39 = vmul.f32 %v31_v36, %v31_v36  ;;  %v33_v43 = vld [vmem:[%s417_s1 + $0x60] sm:$0xff]  ;;  %v34_v44 = vld [vmem:[%s417_s1 + $0x68] sm:$0xff] }
   0xb   :  { %v137_v24 = vadd.f32 %v136_v19, %v122_v18  ;;  %v274_v41 = vpack.c.bf16 %v32_v37, %v31_v36  ;;  %v129_v42 = vmul.f32 %v32_v37, %v32_v37  ;;  %287 = vset.pattern.permute.xlu0 %v321_v45  ;;  %v130_v47 = vmul.f32 %v33_v43, %v33_v43  ;;  %v35_v51 = vld [vmem:[%s417_s1 + $0x70] sm:$0xff]  ;;  %v36_v52 = vld [vmem:[%s417_s1 + $0x78] sm:$0xff]  ;;  %v117_v2 = vld [vmem:[#allocation4] sm:$0x1]  ;;  %s322_s1 = smov [#allocation5]  }
   0xc   :  { %v277_v49 = vpack.c.bf16 %v34_v44, %v33_v43  ;;  %v131_v50 = vmul.f32 %v34_v44, %v34_v44  ;;  %v132_v54 = vmul.f32 %v35_v51, %v35_v51  ;;  %v280_v56 = vpack.c.bf16 %v36_v52, %v35_v51  ;;  %v110_v6 = vld [vmem:[#allocation3] sm:$0xff]  ;;  %s198_s14 = sshll.u32 %s322_s1, 4  ;;  %s199_s14 = int_to_ptr.vmem [resolvable:$true] %s198_s14 }
   0xd   :  { %266 = vmatpush3.bf16.msra.mxu0 %v265_v20  ;;  %v138_v26 = vadd.f32 %v137_v24, %v123_v21  ;;  %v133_v57 = vmul.f32 %v36_v52, %v36_v52  ;;  %v174_v14 = vlaneseq  ;;  %s294_s0 = scalar_lea.vmem %s199_s14, 128  ;;  %p299_p1 = scmp.lt.s32.totalorder %s199_s14, %s199_s14 }
   0xe   :  { %267 = vmatprep.subr.bf16.mxu0 %v318_v4  ;;  %p295_p0 = scmp.ne.s32.totalorder %s199_s14, %s294_s0  ;;  %p300_p2 = scmp.lt.s32.totalorder %s294_s0, %s294_s0 }
   0xf   :  { %v139_v31 = vadd.f32 %v138_v26, %v124_v25  ;;  %v175_v15 = vshrl.u32 %v174_v14, 7 }
  0x10   :  { %p301_p3 = por %p300_p2, %p299_p1 }
  0x11   :  { %269 = vmatpush3.bf16.msra.mxu0 %v268_v27  ;;  %v140_v33 = vadd.f32 %v139_v31, %v125_v28  ;;  %v176_v16 = vsub.s32 0, %v175_v15 }
  0x12   :  { %270 = vmatprep.subr.bf16.mxu0 %v318_v4  ;;  %p302_p4 = pnand %p301_p3, %p295_p0 }
  0x13   :  { %v141_v38 = vadd.f32 %v140_v33, %v126_v32 }
  0x15   :  { %272 = vmatpush3.bf16.msra.mxu0 %v271_v34  ;;  %v142_v40 = vadd.f32 %v141_v38, %v127_v35 }
  0x16   :  { %273 = vmatprep.subr.bf16.mxu0 %v318_v4 }
  0x17   :  { %v143_v46 = vadd.f32 %v142_v40, %v128_v39 }
  0x19   :  { %275 = vmatpush3.bf16.msra.mxu0 %v274_v41  ;;  %v144_v48 = vadd.f32 %v143_v46, %v129_v42 }
  0x1a   :  { %276 = vmatprep.subr.bf16.mxu0 %v318_v4 }
  0x1b   :  { %v145_v53 = vadd.f32 %v144_v48, %v130_v47 }
  0x1d   :  { %278 = vmatpush3.bf16.msra.mxu0 %v277_v49  ;;  %v146_v55 = vadd.f32 %v145_v53, %v131_v50 }
  0x1e   :  { %279 = vmatprep.subr.bf16.mxu0 %v318_v4 }
  0x1f   :  { %v147_v58 = vadd.f32 %v146_v55, %v132_v54 }
  0x21   :  { %281 = vmatpush3.bf16.msra.mxu0 %v280_v56  ;;  %v148_v59 = vadd.f32 %v147_v58, %v133_v57 }
  0x23   :  { %v149_v60 = vrot.slane %v148_v59, 4 }
  0x24   :  { %256 = vmatmul.mubr.f32.vlgmr.msra.gmra.mrb[0].mxu0 %v341_v0 }
  0x25   :  { %v150_v61 = vadd.f32 %v149_v60, %v148_v59 }
  0x27   :  { %v151_v62 = vrot.slane %v150_v61, 2 }
  0x29   :  { %v152_v63 = vadd.f32 %v151_v62, %v150_v61 }
  0x2b   :  { %v153_v1 = vrot.slane %v152_v63, 1 }
  0x2d   :  { %v154_v3 = vadd.f32 %v153_v1, %v152_v63 }
  0x2f   :  { %v155_v5 = vadd.f32 %v154_v3, %v117_v2 }
  0x31   :  { %156 = vst [vmem:[#allocation4] sm:$0x1] %v155_v5 }
  0x38   :  { %v163_v12 = vld [vmem:[#allocation4] sm:$0x1] }
  0x39   :  { %v164_v13 = vmax.f32 %v163_v12, 1e-24 }
  0x91   :  { %v113_v7 = vpop.xlane.xlu0 %112 }
  0x92   :  { %v114_v8 = vadd.f32 %v113_v7, %v110_v6 }
  0x94   :  { %116 = vst.msk [vmem:[#allocation3] sm:$0xff] %vm17_vm0, %v114_v8 }
  0x9b   :  { %v160_v4 = vld [vmem:[#allocation3] sm:$0xff] }
  0x9c   :  { %v161_v9 = vmax.f32 %v160_v4, 1e-24 }
  0x9e   :  { %288 = vrsqrt.f32 %v161_v9 }
  0x9f   :  { %290 = vrsqrt.f32 %v164_v13 }
  0xa8   :  { %v289_v10 = vpop.eup %288 }
  0xa9   :  { %169 = vperm.xlu0 %287, %v289_v10   ;;  %v291_v17 = vpop.eup %290 }
  0xaa   :  { %v177_v18 = vrot.slane %v291_v17, %v176_v16 }
  0xf7   :  { %v104_v11 = vpop.f32.mrb[0].mxu0 }
  0xf8   :  { %v257_v0 = vpop.f32.mrb[1].mxu0 }
 0x128   :  { %v170_v19 = vpop.permute.xlu0 %169 }
 0x129   :  { %v172_v20 = vmul.f32 %v170_v19, %v104_v11 }
 0x12b   :  { %v179_v21 = vmul.f32 %v177_v18, %v172_v20 }
 0x12d   :  { %v180_v22 = vmul.f32 2.0, %v179_v21 }
 0x12f   :  { %v181_v23 = vsub.f32 2.0, %v180_v22 }
 0x131   :  { %v182_v24 = vmax.f32 %v181_v23, 0.0 }
 0x133   :  { %v183_v25 = vmin.f32 %v182_v24, 4.0 }
 0x135   :  { %292 = vrsqrt.f32 %v183_v25  ;;  %vm186_vm2 = vcmp.eq.f32.partialorder %v183_v25, inf  ;;  %v189_v28 = vand.u32 2147483648, %v183_v25  ;;  %vm188_vm3 = vcmp.eq.f32.partialorder %v183_v25, 0.0 }
 0x13f   :  { %v293_v26 = vpop.eup %292 }
 0x140   :  { %v185_v27 = vmul.f32 %v293_v26, %v183_v25 }
 0x142   :  { %v187_v29 = vsel %vm186_vm2, %v183_v25, %v185_v27 }
 0x143   :  { %v190_v30 = vsel %vm188_vm3, %v189_v28, %v187_v29 }
 0x144   :  { %191 = vst [vmem:[#allocation5] sm:$0xff] %v190_v30 }
 0x145   :  { %305 = shalt.err (!%p302_p4)
}
 0x146   :  { %s306_s17 = scalar_lea.hbm %s418_s2, 128 }
 0x147   :  { %p307_p5 = scmp.ne.s32.totalorder %s418_s2, %s306_s17  ;;  %p310_p6 = scmp.lt.u32.totalorder %s306_s17, %s418_s2 }
 0x149   :  { %p312_p7 = pnand %p310_p6, %p307_p5 }
 0x14b   :  { %315 = shalt.err (!%p312_p7)
}
 0x14c   :  { %201 = dma.vmem_to_hbm [thread:$0]  %s199_s14, 128, %s418_s2, [#allocation6]  }
 0x14d   :  { %316 = dma.done.wait [#allocation6], 128  }
 0x14e   :  { %317 = vsyncadd [#allocation6], 4294967168 }
 0x14f   :  { %205 = vsyncpa [#allocation6], 1 }

</bundles_post_ra>
